<compile_context>
chip_gen: v7x
topology: tpu7x:2x2x1
jax: 0.10.0
libtpu: 0.0.40
codegen_flags: <defaults>
</compile_context>

<pallas_src>
import jax
import jax.numpy as jnp
from jax import lax
from jax.experimental import pallas as pl
from jax.experimental.pallas import tpu as pltpu


def _round_up(x, m):
    return (x + m - 1) // m * m


def _vmem_budget_bytes():
    """Per-generation VMEM budget (~75% of physical, capped), with a safe fallback."""
    cap = 64 * 1024 * 1024          # v7x per-TC capacity as a conservative default
    try:
        info = pltpu.get_tpu_info()
        cap = int(getattr(info, "vmem_capacity_bytes", cap)) or cap
    except Exception:
        pass
    return min(cap * 3 // 4, 112 * 1024 * 1024)


def _pick_tiles(Np, Cp, Fp, out_bytes, budget):
    """Largest (tm, tn) whose double-buffered footprint fits the VMEM budget."""
    tm = min(512, Np)               # sublane multiple of 8 (Np already is)
    tn = min(1024, Cp)              # lane multiple of 128 (Cp already is)

    def footprint(tm_, tn_):
        return (2 * 2 * tm_ * Fp              # x tile (bf16, double-buffered)
                + 2 * 2 * tn_ * Fp            # weight strip (bf16, double-buffered)
                + 2 * tm_ * tn_ * out_bytes   # output tile (double-buffered)
                + 2 * 4 * tm_                 # confidence column
                + 2 * 4 * 8 * tn_)            # packed bias / magnitude / margin

    while footprint(tm, tn) > budget and (tm > 8 or tn > 128):
        if tn > 128 and (tn >= tm or tm <= 8):
            tn = max(128, (tn // 256) * 128)
        else:
            tm = max(8, (tm // 16) * 8)
    return tm, tn


def disalign_kernel(x_ref, w_ref, vec_ref, conf_ref, o_ref):
    """Computes one (tm, tn) output tile of DisAlignLinear.

    x_ref   : (tm, Fp) bf16   feature row tile
    w_ref   : (tn, Fp) bf16   classifier weight strip (PyTorch (C, F) layout)
    vec_ref : (8,  tn) f32    row 0 = bias, row 1 = magnitude, row 2 = margin
    conf_ref: (tm, 1)  f32    precomputed sigmoid confidence
    o_ref   : (tm, tn)
    """
    # MXU matmul with the contraction on the last dim of both operands
    # (weight stays in (C, F) layout; no wrapper-side transpose), f32 accumulation.
    logits = lax.dot_general(
        x_ref[...], w_ref[...],
        dimension_numbers=(((1,), (1,)), ((), ())),
        preferred_element_type=jnp.float32)
    logits = logits + vec_ref[0:1, :]                       # + bias

    conf = conf_ref[...]                                    # (tm, 1) f32
    # (1 + conf*mag)*logits + conf*mar  ==  logits + conf*(mag*logits + mar)
    out = logits + conf * (vec_ref[1:2, :] * logits + vec_ref[2:3, :])
    o_ref[...] = out.astype(o_ref.dtype)


def prepare_disalign_params(weight, bias, conf_weight, conf_bias, magnitude, margin):
    """One-time parameter formatting (keep this OFF the per-call hot path)."""
    C, F = weight.shape
    Cp, Fp = _round_up(C, 128), _round_up(F, 128)

    w_bf = weight.astype(jnp.bfloat16)
    if (Cp, Fp) != (C, F):
        w_bf = jnp.zeros((Cp, Fp), jnp.bfloat16).at[:C, :F].set(w_bf)

    vec = jnp.zeros((8, Cp), jnp.float32)
    vec = vec.at[0, :C].set(bias.reshape(-1).astype(jnp.float32))
    vec = vec.at[1, :C].set(magnitude.reshape(-1).astype(jnp.float32))
    vec = vec.at[2, :C].set(margin.reshape(-1).astype(jnp.float32))

    wc = conf_weight.reshape(1, F).astype(jnp.float32)
    bc = conf_bias.reshape(1, 1).astype(jnp.float32)
    return dict(w=w_bf, vec=vec, wc=wc, bc=bc, num_classes=C, feat_dim=F)


def disalign_linear_apply(x, params, *, out_dtype=None):
    """DisAlignLinear (use_norm=False) forward given pre-formatted params."""
    N, F = x.shape
    assert F == params["feat_dim"]
    C = params["num_classes"]
    w_p, vec_p = params["w"], params["vec"]
    Cp, Fp = w_p.shape
    Np = _round_up(N, 8)
    out_dtype = out_dtype or x.dtype
    out_bytes = jnp.dtype(out_dtype).itemsize

    # Confidence head in f32 (matches PyTorch numerics) via a trivial XLA mat-vec.
    conf = jax.nn.sigmoid(x.astype(jnp.float32) @ params["wc"].T + params["bc"])  # (N, 1)

    # Minimal padding: rows to a sublane multiple, features to a lane multiple.
    # Feature padding of x must be zeros since F is the contraction dim.
    x_bf = x.astype(jnp.bfloat16)
    if (Np, Fp) != (N, F):
        x_bf = jnp.zeros((Np, Fp), jnp.bfloat16).at[:N, :F].set(x_bf)
    if Np != N:
        conf = jnp.zeros((Np, 1), jnp.float32).at[:N].set(conf)

    budget = _vmem_budget_bytes()
    tm, tn = _pick_tiles(Np, Cp, Fp, out_bytes, budget)
    n_i = pl.cdiv(Np, tm)          # row tiles
    n_j = pl.cdiv(Cp, tn)          # class tiles

    # Grid ordering that minimises operand re-streaming from HBM:
    #  rows innermost  -> weight strip stays VMEM-resident, x streamed n_j times;
    #  classes innermost -> x stays resident, weight streamed n_i times.
    rows_inner = (n_j * Np + Cp) <= (Np + n_i * Cp)
    if rows_inner:
        grid = (n_j, n_i)
        x_map = lambda j, i: (i, 0)
        w_map = lambda j, i: (j, 0)
        vec_map = lambda j, i: (0, j)
        conf_map = lambda j, i: (i, 0)
        out_map = lambda j, i: (i, j)
    else:
        grid = (n_i, n_j)
        x_map = lambda i, j: (i, 0)
        w_map = lambda i, j: (j, 0)
        vec_map = lambda i, j: (0, j)
        conf_map = lambda i, j: (i, 0)
        out_map = lambda i, j: (i, j)

    out = pl.pallas_call(
        disalign_kernel,
        out_shape=jax.ShapeDtypeStruct((Np, Cp), out_dtype),
        grid_spec=pltpu.PrefetchScalarGridSpec(
            num_scalar_prefetch=0,
            grid=grid,
            in_specs=[
                pl.BlockSpec((tm, Fp), x_map),    # feature row tile
                pl.BlockSpec((tn, Fp), w_map),    # classifier weight ((C, F) layout)
                pl.BlockSpec((8, tn), vec_map),   # packed bias / magnitude / margin
                pl.BlockSpec((tm, 1), conf_map),  # precomputed confidence
            ],
            out_specs=pl.BlockSpec((tm, tn), out_map),
        ),
        compiler_params=pltpu.CompilerParams(
            dimension_semantics=("parallel", "parallel"),
            vmem_limit_bytes=int(budget),
        ),
    )(x_bf, w_p, vec_p, conf)

    if (Np, Cp) != (N, C):
        out = out[:N, :C]
    return out


def disalign_linear(x, weight, bias, conf_weight, conf_bias, magnitude, margin):
    params = prepare_disalign_params(weight, bias, conf_weight, conf_bias,
                                     magnitude, margin)
    return disalign_linear_apply(x, params)


if __name__ == "__main__":
    feat_dim, num_classes, batch = 32, 16, 8

    key = jax.random.PRNGKey(0)
    kx, kw, kb, kbc = jax.random.split(key, 4)

    x = jax.random.normal(kx, (batch, feat_dim), dtype=jnp.float32)

    # nn.Linear(feat_dim, num_classes): weight (C, F) ~ U(-1/sqrt(F), 1/sqrt(F)).
    bound = 1.0 / (feat_dim ** 0.5)
    w = jax.random.uniform(kw, (num_classes, feat_dim), minval=-bound, maxval=bound)
    b = jax.random.uniform(kb, (num_classes,), minval=-bound, maxval=bound)

    # confidence_layer: weight constant 0.1 (torch init), random bias.
    wc = jnp.full((1, feat_dim), 0.1, dtype=jnp.float32)
    bc = jax.random.uniform(kbc, (1,), minval=-bound, maxval=bound)

    learned_magnitude = jnp.ones((1, num_classes), dtype=jnp.float32)
    learned_margin = jnp.zeros((1, num_classes), dtype=jnp.float32)

    out = disalign_linear(x, w, b, wc, bc, learned_magnitude, learned_margin)
    out = jax.block_until_ready(out)

    # Plain-JAX f32 reference. Kernel uses bf16 MXU operands with f32 accumulation,
    # so compare with a correspondingly loosened tolerance.
    logits_ref = x @ w.T + b
    conf_ref = jax.nn.sigmoid(x @ wc.T + bc)
    ref = (1.0 + conf_ref * learned_magnitude) * logits_ref + conf_ref * learned_margin
    assert out.shape == (batch, num_classes)
    assert out.dtype == jnp.float32
    assert jnp.allclose(out, ref, atol=2e-2, rtol=2e-2), "mismatch vs reference"

    print("KERNEL_OK")
</pallas_src>

<mosaic_0001>
module attributes {stable_mosaic.version = 11 : i64} {
  func.func @disalign_kernel(%arg0: i32, %arg1: i32, %arg2: memref<8x128xbf16, #tpu.memory_space<vmem>>, %arg3: memref<128x128xbf16, #tpu.memory_space<vmem>>, %arg4: memref<8x128xf32, #tpu.memory_space<vmem>>, %arg5: memref<8x1xf32, #tpu.memory_space<vmem>>, %arg6: memref<8x128xf32, #tpu.memory_space<vmem>>) attributes {dimension_semantics = [#tpu.dimension_semantics<parallel>, #tpu.dimension_semantics<parallel>], iteration_bounds = array<i64: 1, 1>, scalar_prefetch = 0 : i64, scratch_operands = 0 : i64, tpu.core_type = #tpu.core_type<tc>, window_params = [{transform_indices = @transform_0, window_bounds = array<i64: 8, 128>}, {transform_indices = @transform_1, window_bounds = array<i64: 128, 128>}, {transform_indices = @transform_2, window_bounds = array<i64: 8, 128>}, {transform_indices = @transform_3, window_bounds = array<i64: 8, 1>}, {transform_indices = @transform_4, window_bounds = array<i64: 8, 128>}]} {
    %c0 = arith.constant 0 : index
    %c0_0 = arith.constant 0 : index
    %0 = vector.load %arg2[%c0, %c0_0] : memref<8x128xbf16, #tpu.memory_space<vmem>>, vector<8x128xbf16>
    %c0_1 = arith.constant 0 : index
    %c0_2 = arith.constant 0 : index
    %1 = vector.load %arg3[%c0_1, %c0_2] : memref<128x128xbf16, #tpu.memory_space<vmem>>, vector<128x128xbf16>
    %cst = arith.constant dense<0.000000e+00> : vector<8x128xf32>
    %2 = tpu.matmul %0, %1, %cst {dimension_numbers = #tpu.dot_dimension_numbers<[1], [1], [0], [0], [0, 0, 1, 0], [], []>} : vector<8x128xbf16>, vector<128x128xbf16>, vector<8x128xf32> -> vector<8x128xf32>
    %c0_3 = arith.constant 0 : index
    %c0_4 = arith.constant 0 : index
    %3 = vector.load %arg4[%c0_3, %c0_4] : memref<8x128xf32, #tpu.memory_space<vmem>>, vector<1x128xf32>
    %4 = vector.broadcast %3 : vector<1x128xf32> to vector<8x128xf32>
    %5 = arith.addf %2, %4 : vector<8x128xf32>
    %c0_5 = arith.constant 0 : index
    %c0_6 = arith.constant 0 : index
    %6 = vector.load %arg5[%c0_5, %c0_6] : memref<8x1xf32, #tpu.memory_space<vmem>>, vector<8x1xf32>
    %c1 = arith.constant 1 : index
    %c0_7 = arith.constant 0 : index
    %7 = vector.load %arg4[%c1, %c0_7] : memref<8x128xf32, #tpu.memory_space<vmem>>, vector<1x128xf32>
    %8 = vector.broadcast %7 : vector<1x128xf32> to vector<8x128xf32>
    %9 = arith.mulf %8, %5 : vector<8x128xf32>
    %c2 = arith.constant 2 : index
    %c0_8 = arith.constant 0 : index
    %10 = vector.load %arg4[%c2, %c0_8] : memref<8x128xf32, #tpu.memory_space<vmem>>, vector<1x128xf32>
    %11 = vector.broadcast %10 : vector<1x128xf32> to vector<8x128xf32>
    %12 = arith.addf %9, %11 : vector<8x128xf32>
    %13 = vector.broadcast %6 : vector<8x1xf32> to vector<8x128xf32>
    %14 = arith.mulf %13, %12 : vector<8x128xf32>
    %15 = arith.addf %5, %14 : vector<8x128xf32>
    %c0_9 = arith.constant 0 : index
    %c0_10 = arith.constant 0 : index
    %16 = vector.load %arg6[%c0_9, %c0_10] : memref<8x128xf32, #tpu.memory_space<vmem>>, vector<8x128xf32>
    tpu.vector_store %arg6[%c0_9, %c0_10], %15 {strides = array<i32>} : memref<8x128xf32, #tpu.memory_space<vmem>>, vector<8x128xf32>,
    return
  }
  func.func @transform_0(%arg0: i32, %arg1: i32) -> (i32, i32) {
    %c0_i32 = arith.constant 0 : i32
    %c0_i32_0 = arith.constant 0 : i32
    return %arg1, %c0_i32 : i32, i32
  }
  func.func @transform_1(%arg0: i32, %arg1: i32) -> (i32, i32) {
    %c0_i32 = arith.constant 0 : i32
    %c0_i32_0 = arith.constant 0 : i32
    return %arg0, %c0_i32 : i32, i32
  }
  func.func @transform_2(%arg0: i32, %arg1: i32) -> (i32, i32) {
    %c0_i32 = arith.constant 0 : i32
    %c0_i32_0 = arith.constant 0 : i32
    return %c0_i32, %arg0 : i32, i32
  }
  func.func @transform_3(%arg0: i32, %arg1: i32) -> (i32, i32) {
    %c0_i32 = arith.constant 0 : i32
    %c0_i32_0 = arith.constant 0 : i32
    return %arg1, %c0_i32 : i32, i32
  }
  func.func @transform_4(%arg0: i32, %arg1: i32) -> (i32, i32) {
    %c0_i32 = arith.constant 0 : i32
    return %arg1, %arg0 : i32, i32
  }
}

</mosaic_0001>

<bundles_post_ra>
// kernel: tpu_custom_call.1
= control target key start
LH: loop header
LB: loop body
LE: loop exit
PB: predicated region body
PF: predicated region fallthrough
CT: control target
= control target key end

     0   :  { %9 = vsyncpa [#allocation3], 0  ;;  %s354_s0 = inlined_call_operand.vmem [shape: bf16[8,128], index: 0, kind: input, shape index: {}]   ;;  %s355_s1 = inlined_call_operand.hbm [shape: bf16[128,128], index: 1, kind: input, shape index: {}]   ;;  %s356_s2 = inlined_call_operand.vmem [shape: f32[8,128], index: 2, kind: input, shape index: {}]   ;;  %s357_s3 = inlined_call_operand.vmem [shape: f32[8,1], index: 3, kind: input, shape index: {}]   ;;  %s358_s4 = inlined_call_operand.hbm [shape: f32[8,128], index: 4, kind: output, shape index: {}]  }
   0x1   :  { %10 = vsyncpa [#allocation4], 0  ;;  %s283_s15 = smov [#allocation2]   ;;  %s235_s19 = scalar_lea.hbm %s355_s1, 1024 }
   0x2   :  { %s18_s16 = sshll.u32 %s283_s15, 4  ;;  %p236_p0 = scmp.ne.s32.totalorder %s355_s1, %s235_s19  ;;  %s19_s16 = int_to_ptr.vmem [resolvable:$true] %s18_s16 }
   0x3   :  { %p239_p1 = scmp.lt.u32.totalorder %s235_s19, %s355_s1 }
   0x5   :  { %p241_p2 = pnand %p239_p1, %p236_p0 }
   0x7   :  { %244 = shalt.err (!%p241_p2)
}
   0x8   :  { %s245_s24 = scalar_lea.vmem %s19_s16, 1024  ;;  %p250_p4 = scmp.lt.s32.totalorder %s19_s16, %s19_s16 }
   0x9   :  { %p246_p3 = scmp.ne.s32.totalorder %s19_s16, %s245_s24  ;;  %p251_p5 = scmp.lt.s32.totalorder %s245_s24, %s245_s24 }
   0xb   :  { %p252_p6 = por %p251_p5, %p250_p4 }
   0xd   :  { %p253_p7 = pnand %p252_p6, %p246_p3 }
   0xf   :  { %256 = shalt.err (!%p253_p7)
}
  0x10   :  { %s284_s25 = smov 64   ;;  %s285_s26 = smov 4  }
  0x11   :  { %24 = dma.hbm_to_vmem [thread:$0]  %s355_s1, 1024, %s19_s16, [#allocation3], %s284_s25, %s284_s25, %s285_s26  }
  0x12   :  { %279 = dma.done.wait [#allocation3], 1024  }
  0x13   :  { %280 = vsyncadd [#allocation3], 4294966272  ;;  %v286_v0 = vmov 0.0   ;;  %vm287_vm0 = vmmov 0   ;;  %v288_v1 = vmov 0   ;;  %v227_v2 = vld [vmem:[#allocation2] sm:$0xff]  }
  0x14   :  { %199 = vmatprep.subr.bf16.mxu0 %v286_v0  ;;  %215 = vmatprep.mubr.msk.bf16.mxu0 %vm287_vm0, %v286_v0  ;;  %v228_v3 = vld [vmem:[#allocation2 + $0x8] sm:$0xff]   ;;  %v143_v4 = vld [vmem:[%s357_s3] sm:$0xff]  ;;  %v229_v5 = vld [vmem:[#allocation2 + $0x10] sm:$0xff]  }
  0x15   :  { %226 = vset.pattern.permute.xlu0 %v288_v1  ;;  %200 = vmatpush3.bf16.xpose.msra.mxu0 %v227_v2  ;;  %v230_v6 = vld [vmem:[#allocation2 + $0x18] sm:$0xff]   ;;  %v231_v7 = vld [vmem:[#allocation2 + $0x20] sm:$0xff]   ;;  %v232_v8 = vld [vmem:[#allocation2 + $0x28] sm:$0xff]  }
  0x16   :  { %201 = vmatprep.subr.bf16.mxu0 %v286_v0  ;;  %158 = vperm.xlu0 %226, %v143_v4   ;;  %v233_v9 = vld [vmem:[#allocation2 + $0x30] sm:$0xff]   ;;  %v234_v10 = vld [vmem:[#allocation2 + $0x38] sm:$0xff]   ;;  %v33_v11 = vld [vmem:[%s354_s0] sm:$0xf]  ;;  %s289_s0 = smov [#allocation5]  }
  0x17   :  { %v179_v12 = vld [vmem:[%s356_s2] ss:$0 sm:$0xff]  ;;  %v188_v14 = vld [vmem:[%s356_s2 + $0x1] ss:$0 sm:$0xff]  ;;  %v189_v18 = vld [vmem:[%s356_s2 + $0x2] ss:$0 sm:$0xff] }
  0x18   :  { %s170_s11 = sshll.u32 %s289_s0, 4  ;;  %s171_s11 = int_to_ptr.vmem [resolvable:$true] %s170_s11 }
  0x19   :  { %s257_s12 = scalar_lea.vmem %s171_s11, 128  ;;  %p262_p9 = scmp.lt.s32.totalorder %s171_s11, %s171_s11 }
  0x1a   :  { %p258_p8 = scmp.ne.s32.totalorder %s171_s11, %s257_s12  ;;  %p263_p10 = scmp.lt.s32.totalorder %s257_s12, %s257_s12 }
  0x1c   :  { %p264_p11 = por %p263_p10, %p262_p9 }
  0x1d   :  { %202 = vmatpush3.bf16.xpose.msra.mxu0 %v228_v3 }
  0x1e   :  { %203 = vmatprep.subr.bf16.mxu0 %v286_v0  ;;  %p265_p12 = pnand %p264_p11, %p258_p8 }
  0x25   :  { %204 = vmatpush3.bf16.xpose.msra.mxu0 %v229_v5 }
  0x26   :  { %205 = vmatprep.subr.bf16.mxu0 %v286_v0 }
  0x2d   :  { %206 = vmatpush3.bf16.xpose.msra.mxu0 %v230_v6 }
  0x2e   :  { %207 = vmatprep.subr.bf16.mxu0 %v286_v0 }
  0x35   :  { %208 = vmatpush3.bf16.xpose.msra.mxu0 %v231_v7 }
  0x36   :  { %209 = vmatprep.subr.bf16.mxu0 %v286_v0 }
  0x3d   :  { %210 = vmatpush3.bf16.xpose.msra.mxu0 %v232_v8 }
  0x3e   :  { %211 = vmatprep.subr.bf16.mxu0 %v286_v0 }
  0x45   :  { %212 = vmatpush3.bf16.xpose.msra.mxu0 %v233_v9 }
  0x46   :  { %213 = vmatprep.subr.bf16.mxu0 %v286_v0 }
  0x4d   :  { %214 = vmatpush3.bf16.xpose.msra.mxu0 %v234_v10 }
  0x54   :  { %216 = vmatmul.mubr.bf16.vlgmr.msra.gmra.mrb[0].mxu0 %v33_v11 }
  0x95   :  { %v159_v21 = vpop.permute.xlu0 %158 }
 0x127   :  { %v137_v13 = vpop.f32.mrb[0].mxu0 }
 0x128   :  { %v138_v15 = vadd.f32 %v179_v12, %v137_v13  ;;  %v217_v16 = vpop.f32.mrb[1].mxu0 }
 0x129   :  { %v140_v17 = vpop.f32.mrb[2].mxu0 }
 0x12a   :  { %v149_v19 = vmul.f32 %v188_v14, %v138_v15  ;;  %v218_v20 = vpop.f32.mrb[3].mxu0 }
 0x12c   :  { %v155_v22 = vadd.f32 %v189_v18, %v149_v19 }
 0x12e   :  { %v161_v23 = vmul.f32 %v159_v21, %v155_v22 }
 0x130   :  { %v162_v24 = vadd.f32 %v161_v23, %v138_v15 }
 0x132   :  { %163 = vst [vmem:[#allocation5] sm:$0xff] %v162_v24 }
 0x133   :  { %268 = shalt.err (!%p265_p12)
}
 0x134   :  { %s269_s2 = scalar_lea.hbm %s358_s4, 128 }
 0x135   :  { %p270_p13 = scmp.ne.s32.totalorder %s358_s4, %s269_s2  ;;  %p273_p0 = scmp.lt.u32.totalorder %s269_s2, %s358_s4 }
 0x137   :  { %p275_p1 = pnand %p273_p0, %p270_p13 }
 0x139   :  { %278 = shalt.err (!%p275_p1)
}
 0x13a   :  { %173 = dma.vmem_to_hbm [thread:$0]  %s171_s11, 128, %s358_s4, [#allocation4]  }
 0x13b   :  { %281 = dma.done.wait [#allocation4], 128  }
 0x13c   :  { %282 = vsyncadd [#allocation4], 4294967168 }
 0x13d   :  { %177 = vsyncpa [#allocation3], 1 }
 0x13e   :  { %178 = vsyncpa [#allocation4], 1 }

</bundles_post_ra>
